<compile_context>
chip_gen: v7x
topology: tpu7x:2x2x1
jax: 0.10.0
libtpu: 0.0.40
codegen_flags: <defaults>
</compile_context>

<pallas_src>
import functools

import jax
import jax.numpy as jnp
from jax.experimental import pallas as pl
from jax.experimental.pallas import tpu as pltpu


def _bn_pad_kernel(params_ref, x_ref, o_ref, *, pad):
    """One block of G fused (n, c) image planes per grid step.

    params_ref: (G, 1, 2) f32 VMEM; [..., 0] = scale = w/sqrt(var+eps),
                [..., 1] = shift = b - mean*scale (shift is also the pad value).
    x_ref: (G, H, W) input planes.
    o_ref: (G, H+2p, W+2p) output planes.
    """
    g, h, w = x_ref.shape
    _, hp, wp = o_ref.shape

    p = params_ref[...]                      # (G, 1, 2) f32
    scale = p[:, :, 0:1]                     # (G, 1, 1)
    shift = p[:, :, 1:2]                     # (G, 1, 1)

    y = (x_ref[...].astype(jnp.float32) * scale + shift).astype(o_ref.dtype)

    if pad == 0:
        o_ref[...] = y
        return

    # Interior: written exactly once.
    o_ref[:, pad:pad + h, pad:pad + w] = y

    # Border: pad value == BN(0) == shift. Four strips, each written once.
    border = shift.astype(o_ref.dtype)       # (G, 1, 1)
    o_ref[:, 0:pad, :] = jnp.broadcast_to(border, (g, pad, wp))
    o_ref[:, pad + h:hp, :] = jnp.broadcast_to(border, (g, pad, wp))
    o_ref[:, pad:pad + h, 0:pad] = jnp.broadcast_to(border, (g, h, pad))
    o_ref[:, pad:pad + h, pad + w:wp] = jnp.broadcast_to(border, (g, h, pad))


def _round_up(v, m):
    return ((v + m - 1) // m) * m


def _sublane_multiple(itemsize):
    # f32 -> 8, bf16 -> 16, int8/fp8 -> 32 sublanes per native tile.
    return max(8, 32 // max(1, itemsize))


def _vmem_config():
    """(vmem_limit_bytes, target_block_bytes), generation-aware."""
    cap = None
    try:
        cap = getattr(pltpu.get_tpu_info(), "vmem_capacity_bytes", None)
    except Exception:
        cap = None
    if cap is not None and int(cap) >= (100 << 20):
        # v5e / v6e class: 128 MiB physical VMEM per TensorCore.
        return 80 << 20, 4 << 20
    # v7x class (64 MiB per TC) or unknown: stay conservative.
    return 28 << 20, 2 << 20


def _pick_group(nc, h, w, hp, wp, itemsize, block_budget, target_block_bytes):
    """Planes per grid step, using the (8,128)-tiled VMEM footprint."""
    sub = _sublane_multiple(itemsize)
    in_b = _round_up(h, sub) * _round_up(w, 128) * itemsize
    out_b = _round_up(hp, sub) * _round_up(wp, 128) * itemsize
    par_b = 8 * 128 * 4                       # (1,2) minor dims padded, f32

    per_plane_vmem = 2 * (in_b + out_b + par_b)   # double-buffered in+out+params
    per_plane_data = in_b + out_b

    g = max(1, target_block_bytes // per_plane_data)       # amortize step overhead
    g = min(g, max(1, block_budget // per_plane_vmem))     # stay inside VMEM
    if nc >= 8:
        g = min(g, nc // 8)      # >=8 grid steps -> >=4 per TC on 2-TC chips
    elif nc >= 2:
        g = min(g, nc // 2)
    return int(max(1, min(g, nc)))


@functools.lru_cache(maxsize=None)
def _build_call(nc, h, w, pad, dtype_name, g, vmem_limit):
    dtype = jnp.dtype(dtype_name)
    hp, wp = h + 2 * pad, w + 2 * pad
    kernel = functools.partial(_bn_pad_kernel, pad=pad)
    itemsize = dtype.itemsize
    cost = pl.CostEstimate(
        flops=2 * nc * h * w,
        transcendentals=0,
        bytes_accessed=nc * (h * w + hp * wp) * itemsize + nc * 2 * 4)
    return pl.pallas_call(
        kernel,
        out_shape=jax.ShapeDtypeStruct((nc, hp, wp), dtype),
        grid=(pl.cdiv(nc, g),),
        in_specs=[
            pl.BlockSpec((g, 1, 2), lambda i: (i, 0, 0)),   # packed (scale, shift)
            pl.BlockSpec((g, h, w), lambda i: (i, 0, 0)),   # x planes
        ],
        out_specs=pl.BlockSpec((g, hp, wp), lambda i: (i, 0, 0)),
        compiler_params=pltpu.CompilerParams(
            dimension_semantics=("parallel",),
            vmem_limit_bytes=int(vmem_limit)),
        cost_estimate=cost,
    )


@functools.partial(jax.jit, static_argnames=("pad_pixels", "eps"))
def bn_and_pad(x, weight, bias, running_mean, running_var, *, pad_pixels, eps=1e-5):
    """BNAndPadLayer.forward (eval mode) as a Pallas kernel call."""
    N, C, H, W = x.shape
    p = int(pad_pixels)
    Hp, Wp = H + 2 * p, W + 2 * p
    nc = N * C

    # Fold BN stats into a per-channel affine (plain-JAX glue, f32).
    inv_std = jax.lax.rsqrt(running_var.astype(jnp.float32) + jnp.float32(eps))
    scale = weight.astype(jnp.float32) * inv_std
    shift = bias.astype(jnp.float32) - running_mean.astype(jnp.float32) * scale

    # Pack (scale, shift) per fused (n, c) plane: one small per-step DMA.
    params = jnp.stack([scale, shift], axis=-1)                     # (C, 2)
    params = jnp.broadcast_to(params[None], (N, C, 2)).reshape(nc, 1, 2)

    # Flatten (N, C) so many planes are fused per grid step (free reshape).
    x_flat = x.reshape(nc, H, W)

    vmem_limit, target_block = _vmem_config()
    block_budget = (vmem_limit * 7) // 10     # headroom for compiler scratch
    g = _pick_group(nc, H, W, Hp, Wp, jnp.dtype(x.dtype).itemsize,
                    block_budget, target_block)

    call = _build_call(nc, H, W, p, jnp.dtype(x.dtype).name, g, vmem_limit)
    out_flat = call(params, x_flat)
    return out_flat.reshape(N, C, Hp, Wp)


def _reference(x, weight, bias, running_mean, running_var, *, pad_pixels, eps=1e-5):
    """Pure-JAX reference mirroring the PyTorch forward (eval mode)."""
    inv_std = 1.0 / jnp.sqrt(running_var + eps)
    scale = (weight * inv_std)[None, :, None, None]
    shift = (bias - running_mean * weight * inv_std)[None, :, None, None]
    out = x * scale + shift
    p = pad_pixels
    if p > 0:
        pad_values = (bias - running_mean * weight * inv_std)[None, :, None, None]
        out = jnp.pad(out, ((0, 0), (0, 0), (p, p), (p, p)))
        out = out.at[:, :, 0:p, :].set(pad_values)
        out = out.at[:, :, -p:, :].set(pad_values)
        out = out.at[:, :, :, 0:p].set(pad_values)
        out = out.at[:, :, :, -p:].set(pad_values)
    return out


if __name__ == "__main__":
    N, C, H, W = 2, 4, 16, 16
    pad_pixels = 1
    eps = 1e-5

    key = jax.random.PRNGKey(0)
    kx, kw, kb, km, kv = jax.random.split(key, 5)

    x = jax.random.normal(kx, (N, C, H, W), dtype=jnp.float32)
    weight = 1.0 + 0.1 * jax.random.normal(kw, (C,), dtype=jnp.float32)
    bias = 0.1 * jax.random.normal(kb, (C,), dtype=jnp.float32)
    running_mean = 0.2 * jax.random.normal(km, (C,), dtype=jnp.float32)
    running_var = 1.0 + 0.3 * jax.random.uniform(kv, (C,), dtype=jnp.float32)

    out = bn_and_pad(x, weight, bias, running_mean, running_var,
                     pad_pixels=pad_pixels, eps=eps)
    out = jax.block_until_ready(out)

    ref = _reference(x, weight, bias, running_mean, running_var,
                     pad_pixels=pad_pixels, eps=eps)
    assert out.shape == (N, C, H + 2 * pad_pixels, W + 2 * pad_pixels)
    assert jnp.allclose(out, ref, atol=1e-5, rtol=1e-5)

    print("KERNEL_OK")
</pallas_src>

<mosaic_0001>
module attributes {stable_mosaic.version = 11 : i64} {
  func.func @_bn_pad_kernel(%arg0: i32, %arg1: memref<1x1x2xf32, #tpu.memory_space<vmem>>, %arg2: memref<1x16x16xf32, #tpu.memory_space<vmem>>, %arg3: memref<1x18x18xf32, #tpu.memory_space<vmem>>) attributes {dimension_semantics = [#tpu.dimension_semantics<parallel>], iteration_bounds = array<i64: 8>, scalar_prefetch = 0 : i64, scratch_operands = 0 : i64, tpu.core_type = #tpu.core_type<tc>, window_params = [{transform_indices = @transform_0, window_bounds = array<i64: 1, 1, 2>}, {transform_indices = @transform_1, window_bounds = array<i64: 1, 16, 16>}, {transform_indices = @transform_2, window_bounds = array<i64: 1, 18, 18>}]} {
    %c0 = arith.constant 0 : index
    %c0_0 = arith.constant 0 : index
    %c0_1 = arith.constant 0 : index
    %0 = vector.load %arg1[%c0, %c0_0, %c0_1] : memref<1x1x2xf32, #tpu.memory_space<vmem>>, vector<1x1x2xf32>
    %1 = vector.extract_strided_slice %0 {offsets = [0, 0, 0], sizes = [1, 1, 1], strides = [1, 1, 1]} : vector<1x1x2xf32> to vector<1x1x1xf32>
    %2 = vector.extract_strided_slice %0 {offsets = [0, 0, 1], sizes = [1, 1, 1], strides = [1, 1, 1]} : vector<1x1x2xf32> to vector<1x1x1xf32>
    %c0_2 = arith.constant 0 : index
    %c0_3 = arith.constant 0 : index
    %c0_4 = arith.constant 0 : index
    %3 = vector.load %arg2[%c0_2, %c0_3, %c0_4] : memref<1x16x16xf32, #tpu.memory_space<vmem>>, vector<1x16x16xf32>
    %4 = vector.broadcast %1 : vector<1x1x1xf32> to vector<1x16x16xf32>
    %5 = arith.mulf %3, %4 : vector<1x16x16xf32>
    %6 = vector.broadcast %2 : vector<1x1x1xf32> to vector<1x16x16xf32>
    %7 = arith.addf %5, %6 : vector<1x16x16xf32>
    %c0_5 = arith.constant 0 : index
    %c1 = arith.constant 1 : index
    %c1_6 = arith.constant 1 : index
    %8 = vector.load %arg3[%c0_5, %c1, %c1_6] : memref<1x18x18xf32, #tpu.memory_space<vmem>>, vector<1x16x16xf32>
    tpu.vector_store %arg3[%c0_5, %c1, %c1_6], %7 {strides = array<i32>} : memref<1x18x18xf32, #tpu.memory_space<vmem>>, vector<1x16x16xf32>,
    %9 = vector.shape_cast %2 : vector<1x1x1xf32> to vector<1x1x1xf32>
    %10 = vector.broadcast %9 : vector<1x1x1xf32> to vector<1x1x18xf32>
    %c0_7 = arith.constant 0 : index
    %c0_8 = arith.constant 0 : index
    %c0_9 = arith.constant 0 : index
    %11 = vector.load %arg3[%c0_7, %c0_8, %c0_9] : memref<1x18x18xf32, #tpu.memory_space<vmem>>, vector<1x1x18xf32>
    tpu.vector_store %arg3[%c0_7, %c0_8, %c0_9], %10 {strides = array<i32>} : memref<1x18x18xf32, #tpu.memory_space<vmem>>, vector<1x1x18xf32>,
    %12 = vector.shape_cast %2 : vector<1x1x1xf32> to vector<1x1x1xf32>
    %13 = vector.broadcast %12 : vector<1x1x1xf32> to vector<1x1x18xf32>
    %c0_10 = arith.constant 0 : index
    %c17 = arith.constant 17 : index
    %c0_11 = arith.constant 0 : index
    %14 = vector.load %arg3[%c0_10, %c17, %c0_11] : memref<1x18x18xf32, #tpu.memory_space<vmem>>, vector<1x1x18xf32>
    tpu.vector_store %arg3[%c0_10, %c17, %c0_11], %13 {strides = array<i32>} : memref<1x18x18xf32, #tpu.memory_space<vmem>>, vector<1x1x18xf32>,
    %15 = vector.shape_cast %2 : vector<1x1x1xf32> to vector<1x1x1xf32>
    %16 = vector.broadcast %15 : vector<1x1x1xf32> to vector<1x16x1xf32>
    %c0_12 = arith.constant 0 : index
    %c1_13 = arith.constant 1 : index
    %c0_14 = arith.constant 0 : index
    %17 = vector.load %arg3[%c0_12, %c1_13, %c0_14] : memref<1x18x18xf32, #tpu.memory_space<vmem>>, vector<1x16x1xf32>
    tpu.vector_store %arg3[%c0_12, %c1_13, %c0_14], %16 {strides = array<i32>} : memref<1x18x18xf32, #tpu.memory_space<vmem>>, vector<1x16x1xf32>,
    %18 = vector.shape_cast %2 : vector<1x1x1xf32> to vector<1x1x1xf32>
    %19 = vector.broadcast %18 : vector<1x1x1xf32> to vector<1x16x1xf32>
    %c0_15 = arith.constant 0 : index
    %c1_16 = arith.constant 1 : index
    %c17_17 = arith.constant 17 : index
    %20 = vector.load %arg3[%c0_15, %c1_16, %c17_17] : memref<1x18x18xf32, #tpu.memory_space<vmem>>, vector<1x16x1xf32>
    tpu.vector_store %arg3[%c0_15, %c1_16, %c17_17], %19 {strides = array<i32>} : memref<1x18x18xf32, #tpu.memory_space<vmem>>, vector<1x16x1xf32>,
    return
  }
  func.func @transform_0(%arg0: i32) -> (i32, i32, i32) {
    %c0_i32 = arith.constant 0 : i32
    %c0_i32_0 = arith.constant 0 : i32
    %c0_i32_1 = arith.constant 0 : i32
    return %arg0, %c0_i32, %c0_i32_0 : i32, i32, i32
  }
  func.func @transform_1(%arg0: i32) -> (i32, i32, i32) {
    %c0_i32 = arith.constant 0 : i32
    %c0_i32_0 = arith.constant 0 : i32
    %c0_i32_1 = arith.constant 0 : i32
    return %arg0, %c0_i32, %c0_i32_0 : i32, i32, i32
  }
  func.func @transform_2(%arg0: i32) -> (i32, i32, i32) {
    %c0_i32 = arith.constant 0 : i32
    %c0_i32_0 = arith.constant 0 : i32
    %c0_i32_1 = arith.constant 0 : i32
    return %arg0, %c0_i32, %c0_i32_0 : i32, i32, i32
  }
}

</mosaic_0001>

<bundles_post_ra>
// kernel: bn_and_pad.1
= control target key start
LH: loop header
LB: loop body
LE: loop exit
PB: predicated region body
PF: predicated region fallthrough
CT: control target
= control target key end

     0   :  { %7 = vsyncpa [#allocation3], 0  ;;  %s587_s0 = inlined_call_operand.vmem [shape: f32[8,1,2], index: 0, kind: input, shape index: {}]   ;;  %s588_s1 = inlined_call_operand.hbm [shape: f32[8,16,16], index: 1, kind: input, shape index: {}]   ;;  %s589_s2 = inlined_call_operand.vmem [shape: f32[8,18,18], index: 2, kind: output, shape index: {}]  }
   0x1   :  { %9 = vsyncpa [#allocation3 + $0x1], 0  ;;  %s459_s9 = smov 0   ;;  %s461_s10 = smov 0  }
   0x2   :  { %s463_s11 = smov 0   ;;  %s465_s12 = smov 0  }
   0x3 LB: > { %s478_s13 = sadd.s32 4294967295, %s434_s12   ;;  %s481_s14 = sadd.s32 1, %s434_s12   ;;  %s434_s12 = sphi %s465_s12, %s596_s12   ;;  %s430_s11 = sphi %s463_s11, %s595_s11   ;;  %s426_s10 = sphi %s461_s10, %s594_s10   ;;  %s422_s9 = sphi %s459_s9, %s593_s9  }
   0x4   : > { %s45_s15 = ssub.s32 %s434_s12, %s481_s14  ;;  %s48_s16 = sadd.s32 1, %s430_s11 }
   0x5   : > { %p46_p0 = scmp.eq.s32.totalorder %s45_s15, 0  ;;  %p55_p1 = scmp.ne.s32.totalorder %s430_s11, %s426_s10 }
   0x6   : > { %p56_p2 = scmp.eq.s32.totalorder %s434_s12, 0  ;;  %p61_p3 = scmp.ne.s32.totalorder %s426_s10, %s422_s9 }
   0x7   : > { %s491_s17 = scalar_select %p46_p0, %s430_s11, %s48_s16  }
   0x8   : > { %p57_p4 = por %p56_p2, %p55_p1  ;;  %p62_p5 = scmp.eq.s32.totalorder %s478_s13, 0 }
   0x9   : > { %p327_p6 = scmp.lt.s32.totalorder %s434_s12, 8  ;;  %s117_s19 = sand.u32 1, %s430_s11  }
   0xa   : > { %p495_p7 = por %p62_p5, %p61_p3  ;;  %s311_s20 = sshll.u32 %s117_s19, 4 }
   0xb   : > { %s319_s21 = sshll.u32 %s434_s12, 8  ;;  %s121_s25 = scalar_lea.vmem [#allocation2], %s311_s20 }
   0xc   : > { %s504_s24 = scalar_lea.hbm %s588_s1, %s319_s21  ;;  %s128_s26 = sshll.u32 %s121_s25, 4  ;;  %s506_s26 = int_to_ptr.vmem [resolvable:$true] %s128_s26 }
   0xd   : > { %p508_p8 = pnand %p327_p6, %p57_p4  ;;  %s513_s28 = scalar_lea.sflag [#allocation3], %s117_s19 }
   0xe   : > { %s370_s29 = scalar_lea.hbm %s504_s24, 256  ;;  %s375_s4 = scalar_lea.hbm %s588_s1, 2048 }
   0xf   : > { %p371_p10 = scmp.ne.s32.totalorder %s504_s24, %s370_s29  ;;  %p372_p11 = pneg %p508_p8 }
  0x10   : > { %p376_p0 = scmp.lt.u32.totalorder %s504_s24, %s588_s1  ;;  %p377_p1 = scmp.lt.u32.totalorder %s375_s4, %s370_s29 }
  0x11   : > { %p373_p12 = pnand %p372_p11, %p371_p10  ;;  %p379_p3 = scmp.lt.u32.totalorder %s370_s29, %s504_s24 }
  0x12   : > { %p378_p2 = por %p377_p1, %p376_p0 }
  0x13   : > { %p374_p13 = pneg %p373_p12 }
  0x14   : > { %p380_p4 = por %p379_p3, %p378_p2 }
  0x16   : > { %p381_p5 = pnand %p380_p4, %p374_p13 }
  0x18   : > { %384 = shalt.err (!%p381_p5)
}
  0x19   : > { %s385_s7 = scalar_lea.vmem %s506_s26, 256  ;;  %s436_s8 = smov [#allocation2]  }
  0x1a   : > { %p386_p6 = scmp.ne.s32.totalorder %s506_s26, %s385_s7  ;;  %s390_s9 = sshll.u32 %s436_s8, 4  ;;  %s391_s9 = int_to_ptr.vmem [resolvable:$false] %s390_s9 }
  0x1b   : > { %s392_s15 = scalar_lea.vmem %s391_s9, 512  ;;  %p393_p9 = scmp.lt.s32.totalorder %s506_s26, %s391_s9 }
  0x1c   : > { %p388_p10 = pnand %p386_p6, %p372_p11  ;;  %p394_p0 = scmp.lt.s32.totalorder %s392_s15, %s385_s7 }
  0x1e   : > { %p389_p12 = pneg %p388_p10  ;;  %p395_p1 = por %p394_p0, %p393_p9 }
  0x20   : > { %p396_p2 = pnand %p395_p1, %p389_p12 }
  0x22   : > { %399 = shalt.err (!%p396_p2)
}
  0x23   : > { %s437_s16 = smov 128   ;;  %s438_s19 = smov 8  }
  0x24   : > { %326 = dma.hbm_to_vmem [thread:$0]  (!%p508_p8), %s504_s24, 256, %s506_s26, %s513_s28, %s437_s16, %s437_s16, %s438_s19  }
  0x25   : > { %p136_p11 = scmp.lt.s32.totalorder %s434_s12, 9  ;;  %p592_p13 = scmp.ge.s32.totalorder %s434_s12, 1 }
  0x27   : > { %p137_p3 = pnand %p592_p13, %p136_p11 }
  0x28   : > { %s142_s20 = sand.u32 (!%p137_p3), 1, %s426_s10  }
  0x29   : > { %140 = sbr.rel (%p137_p3) target bundleno = 316 (0x13c), region = 28  ;;  %s545_s21 = sshll.u32 (!%p137_p3), %s142_s20, 4 }
  0x2a   : > { %s143_s22 = scalar_lea.sflag (!%p137_p3), [#allocation3], %s142_s20  ;;  %s146_s23 = scalar_lea.vmem (!%p137_p3), [#allocation2], %s545_s21 }
  0x30   : > { %417 = dma.done.wait (%p495_p7), %s143_s22, 256  }
  0x31   : > { %419 = vsyncadd (%p495_p7), %s143_s22, 4294967040  ;;  %p170_p8 = scmp.lt.s32.totalorder %s478_s13, 7  ;;  %v182_v0 = vlaneseq  ;;  %v439_v1 = vmov 0   ;;  %v440_v2 = vmov 1   ;;  %s441_s18 = smov 127   ;;  %vm217_vm0 = vcmask 139264  }
  0x32   : > { %367 = vset.pattern.permute.xlu0 %v439_v1  ;;  %369 = vset.pattern.permute.xlu1 %v440_v2  ;;  %v179_v10 = vld [vmem:[%s146_s23] sm:$0xff]  ;;  %v180_v12 = vld [vmem:[%s146_s23 + $0x8] sm:$0xff]  ;;  %s443_s30 = smov 16   ;;  %vm206_vm1 = vcmask 138248   ;;  %vm223_vm2 = vcmask 7168   ;;  %vm229_vm3 = vcmask 146568  }
  0x33   : > { %s598_s13 = smov (!%p170_p8, %s478_s13), 7  ;;  %v183_v3 = vshrl.u32 %v182_v0, 7 }
  0x34   : > { %s172_s25 = scalar_lea.vmem %s587_s0, %s598_s13  ;;  %s320_s26 = smul.u32 24, %s598_s13 }
  0x35   : > { %v184_v4 = vsub.s32 0, %v183_v3  ;;  %v178_v5 = vld [vmem:[%s172_s25] sm:$0x1]  ;;  %s442_s13 = smov 1  }
  0x36   : > { %210 = vperm.xlu1 %369, %v178_v5   ;;  %s560_s29 = scalar_lea.vmem %s589_s2, %s320_s26 }
  0x37   : > { %v185_v6 = vrot.slane %v178_v5, %v184_v4 }
  0x39   : > { %187 = vperm.xlu0 %367, %v185_v6  }
  0x3d   : > { %368 = vset.pattern.permute.xlu0 %v440_v2 }
  0x3e   : > { %193 = vperm.xlu0 %368, %v185_v6  }
  0x42   : > { %220 = vrot.lane.b32.xlu0 %v185_v6, %s441_s18 }
  0xb5   : > { %v211_v7 = vpop.permute.xlu1 %210 }
  0xb6   : > { %v216_v8 = vrot.slane %v211_v7, %v184_v4 }
  0xb8   : > { %v188_v9 = vpop.permute.xlu0 %187  ;;  %218 = vst.msk [vmem:[%s560_s29] sm:$0x1] %vm217_vm0, %v216_v8  ;;  %219 = vst.msk [vmem:[%s560_s29 + $0x11] sm:$0x1] %vm217_vm0, %v216_v8 }
  0xb9   : > { %v190_v11 = vmul.f32 %v188_v9, %v179_v10  ;;  %v191_v15 = vmul.f32 %v188_v9, %v180_v12 }
  0xbd   : > { %v194_v13 = vpop.permute.xlu0 %193 }
  0xbe   : > { %v196_v14 = vadd.f32 %v194_v13, %v190_v11  ;;  %v197_v16 = vadd.f32 %v194_v13, %v191_v15 }
  0xc0   : > { %200 = vrot.lane.b32.xlu1 %v196_v14, %s442_s13 }
  0xc1   : > { %v221_v17 = vpop.permute.xlu0 %220 }
  0xc4   : > { %202 = vrot.lane.b32.xlu1 %v197_v16, %s442_s13 }
  0xc8   : > { %226 = vrot.lane.b32.xlu1 %v185_v6, %s443_s30 }
 0x132   : > { %v201_v18 = vpop.permute.xlu1 %200 }
 0x133   : > { %207 = vst.msk [vmem:[%s560_s29 + $0x1] sm:$0xff] %vm206_vm1, %v201_v18 }
 0x134   : > { %224 = vst.msk [vmem:[%s560_s29 + $0x1] sm:$0xff] %vm223_vm2, %v221_v17 }
 0x136   : > { %v203_v19 = vpop.permute.xlu1 %202 }
 0x137   : > { %208 = vst.msk [vmem:[%s560_s29 + $0x9] sm:$0xff] %vm206_vm1, %v203_v19 }
 0x138   : > { %225 = vst.msk [vmem:[%s560_s29 + $0x9] sm:$0xff] %vm223_vm2, %v221_v17 }
 0x13a   : > { %v227_v20 = vpop.permute.xlu1 %226 }
 0x13b   : > { %230 = vst.msk [vmem:[%s560_s29 + $0x1] sm:$0xff] %vm229_vm3, %v227_v20  ;;  %231 = vst.msk [vmem:[%s560_s29 + $0x9] sm:$0xff] %vm229_vm3, %v227_v20 }
 0x13c PF: > { %p12_p7 = scmp.ge.s32.totalorder %s481_s14, 10   ;;  %s593_s9 = smov %s426_s10 }
 0x13d   : > { %s594_s10 = smov %s430_s11  ;;  %s595_s11 = smov %s491_s17 }
 0x13e   : > { %s596_s12 = smov %s481_s14  ;;  %14 = sbr.rel (!%p12_p7) target bundleno = 3 (0x3), region = 71 }
 0x145   :  { %253 = vsyncpa [#allocation3], 1 }
 0x146   :  { %255 = vsyncpa [#allocation3 + $0x1], 1 }

</bundles_post_ra>
